<compile_context>
chip_gen: v7x
topology: tpu7x:2x2x1
jax: 0.10.0
libtpu: 0.0.40
codegen_flags: <defaults>
</compile_context>

<pallas_src>
import numpy as np
import jax
import jax.numpy as jnp
from jax.experimental import pallas as pl
from jax.experimental.pallas import tpu as pltpu


# ---------------------------------------------------------------------------
# bilinear (align_corners=True) interpolation weight matrix
# ---------------------------------------------------------------------------
def _bilinear_matrix(out_size: int, in_size: int) -> np.ndarray:
    """Rows reproduce F.interpolate(..., 'bilinear', align_corners=True)."""
    A = np.zeros((out_size, in_size), dtype=np.float32)
    if out_size == 1:
        src = np.zeros((1,), dtype=np.float64)
    else:
        src = np.arange(out_size, dtype=np.float64) * (in_size - 1) / (out_size - 1)
    lo = np.clip(np.floor(src).astype(np.int64), 0, in_size - 1)
    hi = np.minimum(lo + 1, in_size - 1)
    frac = (src - lo).astype(np.float32)
    for i in range(out_size):
        A[i, lo[i]] += 1.0 - frac[i]
        A[i, hi[i]] += frac[i]
    return A


# ---------------------------------------------------------------------------
# generation-aware H-tile chooser: bound per-block VMEM (2 inputs x 2 buffers)
# ---------------------------------------------------------------------------
def _choose_h_tile(C: int, H: int, W: int) -> int:
    try:
        vmem_bytes = pltpu.get_tpu_info().vmem_capacity_bytes
    except Exception:
        vmem_bytes = 64 * 1024 * 1024          # v7x-conservative fallback
    budget = vmem_bytes // 8                   # headroom: double buffering + scratch
    # candidates satisfy the (8, 128) block rule: th == H or (th % 8 == 0, th | H)
    cands = [H] + [d for d in range(H, 0, -1) if H % d == 0 and d % 8 == 0]
    for th in cands:
        if C * th * W * 4 <= budget:           # f32 target tile is the largest block
            return th
    return cands[-1]


# ---------------------------------------------------------------------------
# Fused kernel: resize (MXU) + softmax / CE / Dice partial sums (VPU + EUP)
# ---------------------------------------------------------------------------
def _fused_loss_kernel(pred_ref, tgt_ref, ah_ref, awt_ref, o_ref):
    x = pred_ref[...]                              # (C, h, w)   f32 logits (low res)
    t = tgt_ref[...]                               # (C, th, W)  f32 one-hot target tile
    C, h, w = x.shape
    th, W = t.shape[1], t.shape[2]

    # --- bilinear resize of the whole channel stack, entirely in VMEM --------
    # W-axis resize first: the intermediate (C, h, W) is lane-dense.
    awt_b = jnp.broadcast_to(awt_ref[...], (C, w, W))
    t1 = jax.lax.dot_general(x, awt_b, (((2,), (1,)), ((0,), (0,))),
                             preferred_element_type=jnp.float32)    # (C, h, W)
    ah_b = jnp.broadcast_to(ah_ref[...], (C, th, h))
    r = jax.lax.dot_general(ah_b, t1, (((2,), (1,)), ((0,), (0,))),
                            preferred_element_type=jnp.float32)     # (C, th, W)

    # --- channel-axis softmax statistics (single exp pass) -------------------
    m = jnp.max(r, axis=0, keepdims=True)          # (1, th, W)
    sh = r - m
    e = jnp.exp(sh)                                # one EUP pass over the block
    sumexp = jnp.sum(e, axis=0, keepdims=True)     # (1, th, W)
    sm = e * pl.reciprocal(sumexp, approx=True)    # softmax via EUP reciprocal

    # CE sum = sum(log(sumexp)) - sum(target * shifted); the strict 0/1 one-hot
    # target doubles as the hard argmax indicator.
    # TODO(synk): soft / tied targets would need the explicit first-max one-hot path.
    ce_p = jnp.sum(jnp.log(sumexp), axis=(0, 1)) - jnp.sum(t * sh, axis=(0, 1))

    # per-lane partial sums over (C, th) -> (W,); final reduction is JAX glue.
    o_ref[0, :] = ce_p                             # CE numerator partial
    o_ref[1, :] = jnp.sum(sm * t, axis=(0, 1))     # dice intersection
    o_ref[2, :] = jnp.sum(sm, axis=(0, 1))         # softmax sum
    o_ref[3, :] = jnp.sum(t, axis=(0, 1))          # target sum


def _head_loss_sums(pred, tgt_f32):
    """Per prediction head: returns [ce_sum, intersection, pred_sum, tgt_sum]."""
    N, C, H, W = tgt_f32.shape
    _, _, h, w = pred.shape
    ah = jnp.asarray(_bilinear_matrix(H, h))        # (H, h)
    awt = jnp.asarray(_bilinear_matrix(W, w).T)     # (w, W)
    th = _choose_h_tile(C, H, W)
    nH = H // th

    # NOTE: on v6e/v7x pred could be fed as bf16 (MXU-native, half the DMA) with
    # preferred_element_type=f32; kept f32 here for bit-closeness to the reference.
    partial = pl.pallas_call(
        _fused_loss_kernel,
        out_shape=jax.ShapeDtypeStruct((N, nH, 4, W), jnp.float32),
        grid=(N, nH),
        in_specs=[
            pl.BlockSpec((None, C, h, w), lambda n, hb: (n, 0, 0, 0)),
            pl.BlockSpec((None, C, th, W), lambda n, hb: (n, 0, hb, 0)),
            pl.BlockSpec((th, h), lambda n, hb: (hb, 0)),
            pl.BlockSpec((w, W), lambda n, hb: (0, 0)),
        ],
        out_specs=pl.BlockSpec((None, None, 4, W), lambda n, hb: (n, hb, 0, 0)),
        compiler_params=pltpu.CompilerParams(
            dimension_semantics=("parallel", "parallel")),
    )(pred.astype(jnp.float32), tgt_f32, ah, awt)

    return jnp.sum(partial, axis=(0, 1, 3))         # (4,)


# ---------------------------------------------------------------------------
# MultiClassLoss.forward equivalent
# ---------------------------------------------------------------------------
def multiclass_loss(preds, target_onehot, weight_ce=0.5, weight_dice=0.5):
    N, C, H, W = target_onehot.shape
    tgt = target_onehot.astype(jnp.float32)         # hoisted: cast/upload once
    smooth = jnp.float32(1.0)
    total = jnp.float32(0.0)
    for pred in preds:
        s = _head_loss_sums(pred, tgt)
        ce_loss = s[0] / jnp.float32(N * H * W)     # CrossEntropyLoss (mean)
        dice_loss = 1.0 - (2.0 * s[1] + smooth) / (s[2] + s[3] + smooth)
        total = total + weight_ce * ce_loss + weight_dice * dice_loss
    return total


# ---------------------------------------------------------------------------
# pure-JAX reference (sanity check only)
# ---------------------------------------------------------------------------
def multiclass_loss_ref(preds, target_onehot, weight_ce=0.5, weight_dice=0.5):
    N, C, H, W = target_onehot.shape
    tgt_idx = jnp.argmax(target_onehot, axis=1)
    total = jnp.float32(0.0)
    for pred in preds:
        _, _, h, w = pred.shape
        ah = jnp.asarray(_bilinear_matrix(H, h))
        aw = jnp.asarray(_bilinear_matrix(W, w))
        r = jnp.einsum("Hh,nchw,Ww->ncHW", ah, pred.astype(jnp.float32), aw)
        log_sm = jax.nn.log_softmax(r, axis=1)
        ce = -jnp.mean(jnp.take_along_axis(log_sm, tgt_idx[:, None], axis=1))
        sm = jax.nn.softmax(r, axis=1)
        inter = jnp.sum(sm * target_onehot)
        dice = 1.0 - (2.0 * inter + 1.0) / (jnp.sum(sm) + jnp.sum(target_onehot) + 1.0)
        total = total + weight_ce * ce + weight_dice * dice
    return total


if __name__ == "__main__":
    key = jax.random.PRNGKey(0)
    k1, k2, k3 = jax.random.split(key, 3)

    N, C, H, W = 2, 4, 16, 16            # num_classes = 4
    labels = jax.random.randint(k1, (N, H, W), 0, C)
    target_onehot = jnp.transpose(jax.nn.one_hot(labels, C, dtype=jnp.float32),
                                  (0, 3, 1, 2))                    # (N, C, H, W)
    preds = [
        jax.random.normal(k2, (N, C, 8, 8), dtype=jnp.float32),    # low-res head
        jax.random.normal(k3, (N, C, 16, 16), dtype=jnp.float32),  # full-res head
    ]

    loss = jax.block_until_ready(multiclass_loss(preds, target_onehot))
    ref = jax.block_until_ready(multiclass_loss_ref(preds, target_onehot))
    # approx reciprocal in the softmax denominator -> slightly looser tolerance
    np.testing.assert_allclose(np.asarray(loss), np.asarray(ref), rtol=2e-3, atol=2e-3)
    print("KERNEL_OK")
</pallas_src>

<mosaic_0001>
module attributes {stable_mosaic.version = 11 : i64} {
  func.func @_fused_loss_kernel(%arg0: i32, %arg1: i32, %arg2: memref<1x4x8x8xf32, #tpu.memory_space<vmem>>, %arg3: memref<1x4x16x16xf32, #tpu.memory_space<vmem>>, %arg4: memref<16x8xf32, #tpu.memory_space<vmem>>, %arg5: memref<8x16xf32, #tpu.memory_space<vmem>>, %arg6: memref<1x1x4x16xf32, #tpu.memory_space<vmem>>) attributes {dimension_semantics = [#tpu.dimension_semantics<parallel>, #tpu.dimension_semantics<parallel>], iteration_bounds = array<i64: 2, 1>, scalar_prefetch = 0 : i64, scratch_operands = 0 : i64, tpu.core_type = #tpu.core_type<tc>, window_params = [{transform_indices = @transform_0, window_bounds = array<i64: 1, 4, 8, 8>}, {transform_indices = @transform_1, window_bounds = array<i64: 1, 4, 16, 16>}, {transform_indices = @transform_2, window_bounds = array<i64: 16, 8>}, {pipeline_mode = #tpu.pipeline_mode<synchronous>, transform_indices = @transform_3, window_bounds = array<i64: 8, 16>}, {transform_indices = @transform_4, window_bounds = array<i64: 1, 1, 4, 16>}]} {
    %c0 = arith.constant 0 : index
    %c0_0 = arith.constant 0 : index
    %c0_1 = arith.constant 0 : index
    %c0_2 = arith.constant 0 : index
    %0 = vector.load %arg2[%c0, %c0_0, %c0_1, %c0_2] : memref<1x4x8x8xf32, #tpu.memory_space<vmem>>, vector<1x4x8x8xf32>
    %1 = vector.shape_cast %0 : vector<1x4x8x8xf32> to vector<4x8x8xf32>
    %c0_3 = arith.constant 0 : index
    %c0_4 = arith.constant 0 : index
    %c0_5 = arith.constant 0 : index
    %c0_6 = arith.constant 0 : index
    %2 = vector.load %arg3[%c0_3, %c0_4, %c0_5, %c0_6] : memref<1x4x16x16xf32, #tpu.memory_space<vmem>>, vector<1x4x16x16xf32>
    %3 = vector.shape_cast %2 : vector<1x4x16x16xf32> to vector<4x16x16xf32>
    %c0_7 = arith.constant 0 : index
    %c0_8 = arith.constant 0 : index
    %4 = vector.load %arg5[%c0_7, %c0_8] : memref<8x16xf32, #tpu.memory_space<vmem>>, vector<8x16xf32>
    %5 = vector.shape_cast %4 : vector<8x16xf32> to vector<1x8x16xf32>
    %6 = vector.broadcast %5 : vector<1x8x16xf32> to vector<4x8x16xf32>
    %cst = arith.constant dense<0.000000e+00> : vector<4x8x16xf32>
    %7 = tpu.matmul %1, %6, %cst {dimension_numbers = #tpu.dot_dimension_numbers<[2], [1], [1], [2], [0, 0, 0, 1, 1, 2], [0], [0]>} : vector<4x8x8xf32>, vector<4x8x16xf32>, vector<4x8x16xf32> -> vector<4x8x16xf32>
    %c0_9 = arith.constant 0 : index
    %c0_10 = arith.constant 0 : index
    %8 = vector.load %arg4[%c0_9, %c0_10] : memref<16x8xf32, #tpu.memory_space<vmem>>, vector<16x8xf32>
    %9 = vector.shape_cast %8 : vector<16x8xf32> to vector<1x16x8xf32>
    %10 = vector.broadcast %9 : vector<1x16x8xf32> to vector<4x16x8xf32>
    %cst_11 = arith.constant dense<0.000000e+00> : vector<4x16x16xf32>
    %11 = tpu.matmul %10, %7, %cst_11 {dimension_numbers = #tpu.dot_dimension_numbers<[2], [1], [1], [2], [0, 0, 0, 1, 1, 2], [0], [0]>} : vector<4x16x8xf32>, vector<4x8x16xf32>, vector<4x16x16xf32> -> vector<4x16x16xf32>
    %cst_12 = arith.constant dense<0xFF800000> : vector<16x16xf32>
    %12 = vector.multi_reduction <maximumf>, %11, %cst_12 [0] : vector<4x16x16xf32> to vector<16x16xf32>
    %13 = vector.shape_cast %12 : vector<16x16xf32> to vector<1x16x16xf32>
    %14 = vector.broadcast %13 : vector<1x16x16xf32> to vector<4x16x16xf32>
    %15 = arith.subf %11, %14 : vector<4x16x16xf32>
    %16 = math.exp %15 : vector<4x16x16xf32>
    %cst_13 = arith.constant dense<0.000000e+00> : vector<16x16xf32>
    %17 = vector.multi_reduction <add>, %16, %cst_13 [0] : vector<4x16x16xf32> to vector<16x16xf32>
    %18 = vector.shape_cast %17 : vector<16x16xf32> to vector<1x16x16xf32>
    %19 = tpu.reciprocal %18 {approx = true} : vector<1x16x16xf32> -> vector<1x16x16xf32>
    %20 = vector.broadcast %19 : vector<1x16x16xf32> to vector<4x16x16xf32>
    %21 = arith.mulf %16, %20 : vector<4x16x16xf32>
    %22 = math.log %18 : vector<1x16x16xf32>
    %cst_14 = arith.constant dense<0.000000e+00> : vector<16xf32>
    %23 = vector.multi_reduction <add>, %22, %cst_14 [0, 1] : vector<1x16x16xf32> to vector<16xf32>
    %24 = arith.mulf %3, %15 : vector<4x16x16xf32>
    %cst_15 = arith.constant dense<0.000000e+00> : vector<16xf32>
    %25 = vector.multi_reduction <add>, %24, %cst_15 [0, 1] : vector<4x16x16xf32> to vector<16xf32>
    %26 = arith.subf %23, %25 : vector<16xf32>
    %c0_16 = arith.constant 0 : index
    %c0_17 = arith.constant 0 : index
    %c0_18 = arith.constant 0 : index
    %c0_19 = arith.constant 0 : index
    %27 = vector.load %arg6[%c0_16, %c0_17, %c0_18, %c0_19] : memref<1x1x4x16xf32, #tpu.memory_space<vmem>>, vector<1x1x1x16xf32>
    %28 = vector.shape_cast %27 : vector<1x1x1x16xf32> to vector<16xf32>
    %29 = vector.shape_cast %26 : vector<16xf32> to vector<1x1x1x16xf32>
    tpu.vector_store %arg6[%c0_16, %c0_17, %c0_18, %c0_19], %29 {strides = array<i32>} : memref<1x1x4x16xf32, #tpu.memory_space<vmem>>, vector<1x1x1x16xf32>,
    %30 = arith.mulf %21, %3 : vector<4x16x16xf32>
    %cst_20 = arith.constant dense<0.000000e+00> : vector<16xf32>
    %31 = vector.multi_reduction <add>, %30, %cst_20 [0, 1] : vector<4x16x16xf32> to vector<16xf32>
    %c0_21 = arith.constant 0 : index
    %c0_22 = arith.constant 0 : index
    %c1 = arith.constant 1 : index
    %c0_23 = arith.constant 0 : index
    %32 = vector.load %arg6[%c0_21, %c0_22, %c1, %c0_23] : memref<1x1x4x16xf32, #tpu.memory_space<vmem>>, vector<1x1x1x16xf32>
    %33 = vector.shape_cast %32 : vector<1x1x1x16xf32> to vector<16xf32>
    %34 = vector.shape_cast %31 : vector<16xf32> to vector<1x1x1x16xf32>
    tpu.vector_store %arg6[%c0_21, %c0_22, %c1, %c0_23], %34 {strides = array<i32>} : memref<1x1x4x16xf32, #tpu.memory_space<vmem>>, vector<1x1x1x16xf32>,
    %cst_24 = arith.constant dense<0.000000e+00> : vector<16xf32>
    %35 = vector.multi_reduction <add>, %21, %cst_24 [0, 1] : vector<4x16x16xf32> to vector<16xf32>
    %c0_25 = arith.constant 0 : index
    %c0_26 = arith.constant 0 : index
    %c2 = arith.constant 2 : index
    %c0_27 = arith.constant 0 : index
    %36 = vector.load %arg6[%c0_25, %c0_26, %c2, %c0_27] : memref<1x1x4x16xf32, #tpu.memory_space<vmem>>, vector<1x1x1x16xf32>
    %37 = vector.shape_cast %36 : vector<1x1x1x16xf32> to vector<16xf32>
    %38 = vector.shape_cast %35 : vector<16xf32> to vector<1x1x1x16xf32>
    tpu.vector_store %arg6[%c0_25, %c0_26, %c2, %c0_27], %38 {strides = array<i32>} : memref<1x1x4x16xf32, #tpu.memory_space<vmem>>, vector<1x1x1x16xf32>,
    %cst_28 = arith.constant dense<0.000000e+00> : vector<16xf32>
    %39 = vector.multi_reduction <add>, %3, %cst_28 [0, 1] : vector<4x16x16xf32> to vector<16xf32>
    %c0_29 = arith.constant 0 : index
    %c0_30 = arith.constant 0 : index
    %c3 = arith.constant 3 : index
    %c0_31 = arith.constant 0 : index
    %40 = vector.load %arg6[%c0_29, %c0_30, %c3, %c0_31] : memref<1x1x4x16xf32, #tpu.memory_space<vmem>>, vector<1x1x1x16xf32>
    %41 = vector.shape_cast %40 : vector<1x1x1x16xf32> to vector<16xf32>
    %42 = vector.shape_cast %39 : vector<16xf32> to vector<1x1x1x16xf32>
    tpu.vector_store %arg6[%c0_29, %c0_30, %c3, %c0_31], %42 {strides = array<i32>} : memref<1x1x4x16xf32, #tpu.memory_space<vmem>>, vector<1x1x1x16xf32>,
    return
  }
  func.func @transform_0(%arg0: i32, %arg1: i32) -> (i32, i32, i32, i32) {
    %c0_i32 = arith.constant 0 : i32
    %c0_i32_0 = arith.constant 0 : i32
    %c0_i32_1 = arith.constant 0 : i32
    %c0_i32_2 = arith.constant 0 : i32
    return %arg0, %c0_i32, %c0_i32_0, %c0_i32_1 : i32, i32, i32, i32
  }
  func.func @transform_1(%arg0: i32, %arg1: i32) -> (i32, i32, i32, i32) {
    %c0_i32 = arith.constant 0 : i32
    %c0_i32_0 = arith.constant 0 : i32
    %c0_i32_1 = arith.constant 0 : i32
    return %arg0, %c0_i32, %arg1, %c0_i32_0 : i32, i32, i32, i32
  }
  func.func @transform_2(%arg0: i32, %arg1: i32) -> (i32, i32) {
    %c0_i32 = arith.constant 0 : i32
    %c0_i32_0 = arith.constant 0 : i32
    return %arg1, %c0_i32 : i32, i32
  }
  func.func @transform_3(%arg0: i32, %arg1: i32) -> (i32, i32) {
    %c0_i32 = arith.constant 0 : i32
    %c0_i32_0 = arith.constant 0 : i32
    %c0_i32_1 = arith.constant 0 : i32
    return %c0_i32, %c0_i32_0 : i32, i32
  }
  func.func @transform_4(%arg0: i32, %arg1: i32) -> (i32, i32, i32, i32) {
    %c0_i32 = arith.constant 0 : i32
    %c0_i32_0 = arith.constant 0 : i32
    %c0_i32_1 = arith.constant 0 : i32
    return %arg0, %arg1, %c0_i32, %c0_i32_0 : i32, i32, i32, i32
  }
}

</mosaic_0001>

<bundles_post_ra>
// kernel: tpu_custom_call.1
= control target key start
LH: loop header
LB: loop body
LE: loop exit
PB: predicated region body
PF: predicated region fallthrough
CT: control target
= control target key end

     0   :  { %9 = vsyncpa [#allocation3], 0  ;;  %s1962_s0 = inlined_call_operand.hbm [shape: f32[2,4,8,8], index: 0, kind: input, shape index: {}]   ;;  %s1963_s1 = inlined_call_operand.hbm [shape: f32[2,4,16,16], index: 1, kind: input, shape index: {}]   ;;  %s1964_s2 = inlined_call_operand.vmem [shape: f32[16,8], index: 2, kind: input, shape index: {}]   ;;  %s1965_s3 = inlined_call_operand.vmem [shape: f32[8,16], index: 3, kind: input, shape index: {}]   ;;  %s1966_s4 = inlined_call_operand.hbm [shape: f32[2,1,4,16], index: 4, kind: output, shape index: {}]  }
   0x1   :  { %11 = vsyncpa [#allocation3 + $0x1], 0 }
   0x2   :  { %12 = vsyncpa [#allocation6], 0 }
   0x3   :  { %14 = vsyncpa [#allocation6 + $0x1], 0 }
   0x4   :  { %15 = vsyncpa [#allocation4], 0 }
   0x5   :  { %17 = vsyncpa [#allocation4 + $0x1], 0  ;;  %s1596_s15 = smov 0   ;;  %s1598_s16 = smov 0  }
   0x6   :  { %s1600_s17 = smov 0   ;;  %s1602_s18 = smov 0  }
   0x7   :  { %s1604_s19 = smov 0   ;;  %s1606_s20 = smov 0  }
   0x8 LB: > { %s1228_s21 = sadd.s32 4294967295, %s1562_s20   ;;  %s1229_s22 = sadd.s32 4294967294, %s1562_s20   ;;  %s1562_s20 = sphi %s1606_s20, %s23_s20   ;;  %s1558_s19 = sphi %s1604_s19, %s1986_s19   ;;  %s1554_s18 = sphi %s1602_s18, %s1985_s18   ;;  %s1550_s17 = sphi %s1600_s17, %s1984_s17   ;;  %s1546_s16 = sphi %s1598_s16, %s1983_s16   ;;  %s1542_s15 = sphi %s1596_s15, %s1982_s15  }
   0x9   : > { %s35_s23 = sadd.s32 1, %s1558_s19  ;;  %s42_s24 = sadd.s32 1, %s1550_s17 }
   0xa   : > { %p37_p0 = scmp.ge.s32.totalorder %s35_s23, 2  ;;  %p49_p1 = scmp.ne.s32.totalorder %s1550_s17, %s1546_s16 }
   0xb   : > { %p50_p2 = scmp.eq.s32.totalorder %s1562_s20, 0  ;;  %p55_p3 = scmp.ne.s32.totalorder %s1546_s16, %s1542_s15 }
   0xc   : > { %s1988_s23 = smov (%p37_p0, %s35_s23), 0  ;;  %p56_p5 = scmp.eq.s32.totalorder %s1228_s21, 0 }
   0xd   : > { %p1637_p4 = por %p50_p2, %p49_p1  ;;  %s39_s26 = ssub.s32 %s1558_s19, %s1988_s23 }
   0xe   : > { %p156_p6 = scmp.eq.s32.totalorder %s1228_s21, 1  ;;  %p40_p7 = scmp.eq.s32.totalorder %s39_s26, 0 }
   0xf   : > { %p1643_p8 = por %p56_p5, %p55_p3  ;;  %p162_p10 = scmp.eq.s32.totalorder %s1229_s22, 1 }
  0x10   : > { %p1647_p9 = por %p156_p6, %p49_p1  ;;  %p1338_p13 = scmp.lt.s32.totalorder %s1562_s20, 2 }
  0x11   : > { %s1971_s27 = scalar_select %p1643_p8, 1, 0 }
  0x12   : > { %s1972_s28 = scalar_select %p1647_p9, 1, 0 }
  0x13   : > { %s1652_s29 = scalar_select %p40_p7, %s1550_s17, %s42_s24  }
  0x14   : > { %p1654_p11 = por %p162_p10, %p55_p3  ;;  %s1661_s5 = sand.u32 1, %s1550_s17  }
  0x15   : > { %s1233_s6 = sshll.u32 %s1661_s5, 5  ;;  %s1259_s7 = sshll.u32 %s1558_s19, 9 }
  0x16   : > { %s1973_s30 = scalar_select %p1654_p11, 1, 0 }
  0x17   : > { %s1668_s10 = scalar_lea.hbm %s1962_s0, %s1259_s7  ;;  %s198_s11 = scalar_lea.vmem [#allocation2], %s1233_s6 }
  0x18   : > { %s205_s12 = sshll.u32 %s198_s11, 4  ;;  %p1674_p0 = pnand %p1338_p13, %p1637_p4  ;;  %s1670_s12 = int_to_ptr.vmem [resolvable:$true] %s205_s12 }
  0x19   : > { %s195_s14 = scalar_lea.sflag [#allocation3], %s1661_s5  ;;  %s1416_s21 = scalar_lea.hbm %s1668_s10, 512 }
  0x1a   : > { %p1417_p2 = scmp.ne.s32.totalorder %s1668_s10, %s1416_s21  ;;  %p1418_p3 = pneg %p1674_p0 }
  0x1b   : > { %s1421_s25 = scalar_lea.hbm %s1962_s0, 1024  ;;  %p1422_p4 = scmp.lt.u32.totalorder %s1668_s10, %s1962_s0 }
  0x1c   : > { %p1419_p5 = pnand %p1418_p3, %p1417_p2  ;;  %p1423_p7 = scmp.lt.u32.totalorder %s1421_s25, %s1416_s21 }
  0x1d   : > { %p1425_p13 = scmp.lt.u32.totalorder %s1416_s21, %s1668_s10 }
  0x1e   : > { %p1420_p6 = pneg %p1419_p5  ;;  %p1424_p10 = por %p1423_p7, %p1422_p4 }
  0x20   : > { %p1426_p12 = por %p1425_p13, %p1424_p10 }
  0x22   : > { %p1427_p1 = pnand %p1426_p12, %p1420_p6 }
  0x24   : > { %1430 = shalt.err (!%p1427_p1)
}
  0x25   : > { %s1431_s7 = scalar_lea.vmem %s1670_s12, 512  ;;  %s1564_s8 = smov [#allocation2]  }
  0x26   : > { %p1432_p2 = scmp.ne.s32.totalorder %s1670_s12, %s1431_s7  ;;  %s1436_s9 = sshll.u32 %s1564_s8, 4  ;;  %s1437_s9 = int_to_ptr.vmem [resolvable:$false] %s1436_s9 }
  0x27   : > { %s1438_s11 = scalar_lea.vmem %s1437_s9, 1024  ;;  %p1439_p9 = scmp.lt.s32.totalorder %s1670_s12, %s1437_s9 }
  0x28   : > { %p1434_p5 = pnand %p1432_p2, %p1418_p3  ;;  %p1440_p4 = scmp.lt.s32.totalorder %s1438_s11, %s1431_s7 }
  0x2a   : > { %p1435_p11 = pneg %p1434_p5  ;;  %p1441_p7 = por %p1440_p4, %p1439_p9 }
  0x2c   : > { %p1442_p10 = pnand %p1441_p7, %p1435_p11 }
  0x2e   : > { %1445 = shalt.err (!%p1442_p10)
}
  0x2f   : > { %s1968_s21 = smov 128   ;;  %s1566_s22 = smov 8  }
  0x30   : > { %1330 = dma.hbm_to_vmem [thread:$0]  (!%p1674_p0), %s1668_s10, 512, %s1670_s12, %s195_s14, %s1968_s21, %s1968_s21, %s1566_s22  }
  0x31   : > { %p236_p9 = scmp.lt.s32.totalorder %s1562_s20, 3  ;;  %s1236_s24 = sshll.u32 %s1661_s5, 6 }
  0x32   : > { %s1260_s25 = sshll.u32 %s1558_s19, 10  ;;  %p1975_p11 = scmp.ge.s32.totalorder %s1562_s20, 1 }
  0x33   : > { %s1722_s8 = scalar_lea.hbm %s1963_s1, %s1260_s25  ;;  %s219_s9 = scalar_lea.vmem [#allocation5], %s1236_s24 }
  0x34   : > { %p1715_p12 = pnand %p1975_p11, %p236_p9  ;;  %s228_s11 = sshll.u32 %s219_s9, 4  ;;  %s1724_s11 = int_to_ptr.vmem [resolvable:$true] %s228_s11 }
  0x35   : > { %s216_s10 = scalar_lea.sflag [#allocation6], %s1661_s5  ;;  %s1446_s12 = scalar_lea.hbm %s1722_s8, 1024 }
  0x36   : > { %p1447_p1 = scmp.ne.s32.totalorder %s1722_s8, %s1446_s12  ;;  %s1451_s25 = scalar_lea.hbm %s1963_s1, 2048 }
  0x37   : > { %p1452_p2 = scmp.lt.u32.totalorder %s1722_s8, %s1963_s1  ;;  %p1453_p5 = scmp.lt.u32.totalorder %s1451_s25, %s1446_s12 }
  0x38   : > { %p1449_p6 = pnand %p1447_p1, %p1418_p3  ;;  %p1455_p7 = scmp.lt.u32.totalorder %s1446_s12, %s1722_s8 }
  0x39   : > { %p1454_p4 = por %p1453_p5, %p1452_p2 }
  0x3a   : > { %p1450_p13 = pneg %p1449_p6 }
  0x3b   : > { %p1456_p10 = por %p1455_p7, %p1454_p4 }
  0x3d   : > { %p1457_p9 = pnand %p1456_p10, %p1450_p13 }
  0x3f   : > { %1460 = shalt.err (!%p1457_p9)
}
  0x40   : > { %s1461_s24 = scalar_lea.vmem %s1724_s11, 1024  ;;  %s1567_s21 = smov [#allocation5]  }
  0x41   : > { %p1462_p11 = scmp.ne.s32.totalorder %s1724_s11, %s1461_s24  ;;  %s1466_s9 = sshll.u32 %s1567_s21, 4  ;;  %s1467_s9 = int_to_ptr.vmem [resolvable:$false] %s1466_s9 }
  0x42   : > { %s1468_s14 = scalar_lea.vmem %s1467_s9, 2048  ;;  %p1469_p8 = scmp.lt.s32.totalorder %s1724_s11, %s1467_s9 }
  0x43   : > { %p1464_p1 = pnand %p1462_p11, %p1418_p3  ;;  %p1470_p2 = scmp.lt.s32.totalorder %s1468_s14, %s1461_s24 }
  0x45   : > { %p1465_p6 = pneg %p1464_p1  ;;  %p1471_p5 = por %p1470_p2, %p1469_p8 }
  0x47   : > { %p1472_p4 = pnand %p1471_p5, %p1465_p6 }
  0x49   : > { %1475 = shalt.err (!%p1472_p4)
}
  0x4a   : > { %s1977_s12 = smov 128   ;;  %240 = sbr.rel (%p1715_p12) target bundleno = 607 (0x25f), region = 36 }
  0x4b   : > { %1333 = dma.hbm_to_vmem [thread:$0]  (!%p1674_p0), %s1722_s8, 1024, %s1724_s11, %s216_s10, %s1977_s12, %s1977_s12, %s1566_s22  }
  0x4c   : > { %s1758_s25 = sand.u32 (!%p1715_p12), 1, %s1546_s16   ;;  %p1978_p8 = scmp.ne.s32.totalorder (!%p1715_p12), %s1971_s27, 0 }
  0x4d   : > { %s1240_s6 = sshll.u32 (!%p1715_p12), %s1758_s25, 5  ;;  %s243_s7 = scalar_lea.sflag (!%p1715_p12), [#allocation3], %s1758_s25 }
  0x4e   : > { %s246_s13 = scalar_lea.vmem (!%p1715_p12), [#allocation2], %s1240_s6 }
  0x51   : > { %1529 = dma.done.wait (%p1978_p8), %s243_s7, 512  }
  0x52   : > { %1531 = vsyncadd (%p1978_p8), %s243_s7, 4294966784  ;;  %s1241_s5 = sshll.u32 %s1758_s25, 6  ;;  %s252_s22 = scalar_lea.sflag [#allocation6], %s1758_s25 }
  0x53   : > { %s1768_s26 = scalar_lea.vmem [#allocation5], %s1241_s5 }
  0x54   : > { %1533 = dma.done.wait (%p1978_p8), %s252_s22, 1024  }
  0x55   : > { %1535 = vsyncadd (%p1978_p8), %s252_s22, 4294966272  ;;  %v1568_v0 = vmov 0.0   ;;  %vm1569_vm0 = vmmov 0   ;;  %vm310_vm1 = vcmask 64512   ;;  %v309_v1 = vld [vmem:[%s1965_s3] sm:$0xff]  ;;  %v298_v3 = vld [vmem:[%s246_s13 + $0x8] sm:$0xff] }
  0x56   : > { %1281 = vmatprep.subr.mxu0 %v1568_v0  ;;  %1286 = vmatprep.subr.mxu1 %v1568_v0  ;;  %v297_v2 = vld [vmem:[%s246_s13] sm:$0xff]  ;;  %v299_v4 = vld [vmem:[%s246_s13 + $0x10] sm:$0xff]  ;;  %v300_v5 = vld [vmem:[%s246_s13 + $0x18] sm:$0xff]  ;;  %vm911_vm2 = vcmask 130048   ;;  %s1242_s9 = sshll.u32 %s1758_s25, 2  ;;  %vm1017_vm3 = vcmask 122880  }
  0x57   : > { %1283 = vmatprep.mubr.msk.f32.mxu0 %vm1569_vm0, %v1568_v0  ;;  %1288 = vmatprep.mubr.msk.f32.mxu1 %vm1569_vm0, %v1568_v0  ;;  %v603_v6 = vld [vmem:[%s1964_s2] sm:$0xff]  ;;  %v604_v9 = vld [vmem:[%s1964_s2 + $0x8] sm:$0xff]  ;;  %v1810_v20 = vld [vmem:[%s1768_s26 + $0x10] sm:$0xff]  ;;  %s1840_s14 = scalar_lea.vmem [#allocation7], %s1242_s9  ;;  %s1256_s12 = sshll.u32 %s1554_s18, 6 }
  0x58   : > { %1282 = vmatpush3.msra.mxu0 %v309_v1  ;;  %1287 = vmatpush3.msra.mxu1 %v309_v1  ;;  %v1800_v16 = vld [vmem:[%s1768_s26 + $0x8] sm:$0xff]  ;;  %v1803_v17 = vld [vmem:[%s1768_s26] sm:$0xff]  ;;  %v1074_v22 = vsel %vm911_vm2, %v1810_v20, 0.0  ;;  %v1815_v23 = vld [vmem:[%s1768_s26 + $0x18] sm:$0xff]  ;;  %s1108_s6 = sshll.u32 %s1840_s14, 4  ;;  %s1909_s5 = scalar_lea.hbm %s1966_s4, %s1256_s12  ;;  %s1911_s6 = int_to_ptr.vmem [resolvable:$true] %s1108_s6 }
  0x59   : > { %1284 = vmatmul.mubr.msk.f32.vlgmr.msra.gmra.mrb[0].mxu0 %vm310_vm1, %v297_v2  ;;  %1289 = vmatmul.mubr.msk.f32.vlgmr.msra.gmra.mrb[0].mxu1 %vm310_vm1, %v298_v3  ;;  %v1071_v18 = vsel %vm911_vm2, %v1803_v17, 0.0  ;;  %v1072_v19 = vsel %vm911_vm2, %v1800_v16, 0.0  ;;  %v1076_v25 = vsel %vm911_vm2, %v1815_v23, 0.0  ;;  %v1820_v26 = vld [vmem:[%s1768_s26 + $0x20] sm:$0xff]  ;;  %v1825_v29 = vld [vmem:[%s1768_s26 + $0x28] sm:$0xff]  ;;  %v1830_v32 = vld [vmem:[%s1768_s26 + $0x38] sm:$0xff] }
  0x5a   : > { %1291 = vmatprep.subr.mxu0 %v1568_v0  ;;  %1296 = vmatprep.subr.mxu1 %v1568_v0  ;;  %v1073_v21 = vadd.f32 %v1072_v19, %v1071_v18  ;;  %v1078_v28 = vsel %vm911_vm2, %v1820_v26, 0.0  ;;  %v1080_v31 = vsel %vm911_vm2, %v1825_v29, 0.0  ;;  %v1833_v33 = vld [vmem:[%s1768_s26 + $0x30] sm:$0xff]  ;;  %v1084_v35 = vsel %vm911_vm2, %v1830_v32, 0.0  ;;  %s1094_s18 = scalar_lea.sflag [#allocation4], %s1758_s25  ;;  %s1476_s22 = scalar_lea.vmem %s1911_s6, 64 }
  0x5b   : > { %1292 = vmatpush3.msra.mxu0 %v309_v1  ;;  %1293 = vmatprep.mubr.msk.f32.mxu0 %vm1569_vm0, %v1568_v0  ;;  %v1082_v36 = vsel %vm911_vm2, %v1833_v33, 0.0  ;;  %p1477_p0 = scmp.ne.s32.totalorder %s1911_s6, %s1476_s22  ;;  %p1979_p3 = scmp.ne.s32.totalorder %s1972_s28, 0 }
  0x5c   : > { %1297 = vmatpush3.msra.mxu1 %v309_v1  ;;  %1298 = vmatprep.mubr.msk.f32.mxu1 %vm1569_vm0, %v1568_v0  ;;  %v1075_v24 = vadd.f32 %v1074_v22, %v1073_v21  ;;  %s1570_s26 = smov [#allocation7]  }
  0x5d   : > { %1294 = vmatmul.mubr.msk.f32.vlgmr.msra.gmra.mrb[2].mxu0 %vm310_vm1, %v299_v4  ;;  %1299 = vmatmul.mubr.msk.f32.vlgmr.msra.gmra.mrb[2].mxu1 %vm310_vm1, %v300_v5  ;;  %p1478_p12 = pnand %p1477_p0, %p1979_p3  ;;  %s1480_s8 = sshll.u32 %s1570_s26, 4  ;;  %s1481_s8 = int_to_ptr.vmem [resolvable:$false] %s1480_s8 }
  0x5e   : > { %1303 = vmatprep.mubr.msk.f32.mxu0 %vm310_vm1, %v603_v6  ;;  %1308 = vmatprep.mubr.msk.f32.mxu1 %vm310_vm1, %v603_v6  ;;  %v1077_v27 = vadd.f32 %v1076_v25, %v1075_v24  ;;  %s1482_s11 = scalar_lea.vmem %s1481_s8, 128  ;;  %p1483_p7 = scmp.lt.s32.totalorder %s1911_s6, %s1481_s8 }
  0x5f   : > { %p1479_p13 = pneg %p1478_p12  ;;  %p1484_p10 = scmp.lt.s32.totalorder %s1482_s11, %s1476_s22 }
  0x60   : > { %v1079_v30 = vadd.f32 %v1078_v28, %v1077_v27 }
  0x61   : > { %p1485_p9 = por %p1484_p10, %p1483_p7 }
  0x62   : > { %v1081_v34 = vadd.f32 %v1080_v31, %v1079_v30 }
  0x63   : > { %p1486_p11 = pnand %p1485_p9, %p1479_p13 }
  0x64   : > { %v1083_v37 = vadd.f32 %v1082_v36, %v1081_v34 }
  0x66   : > { %v1085_v38 = vadd.f32 %v1084_v35, %v1083_v37 }
  0x68   : > { %v1086_v39 = vrot.slane %v1085_v38, 4 }
  0x6a   : > { %v1087_v40 = vadd.f32 %v1086_v39, %v1085_v38 }
  0x6c   : > { %v1088_v41 = vrot.slane %v1087_v40, 2 }
  0x6e   : > { %v1089_v42 = vadd.f32 %v1088_v41, %v1087_v40 }
  0x70   : > { %v1090_v43 = vrot.slane %v1089_v42, 1 }
  0x72   : > { %v1091_v44 = vadd.f32 %v1090_v43, %v1089_v42 }
  0x74   : > { %1092 = vst.msk [vmem:[%s1840_s14 + $0x3] sm:$0x1] %vm1017_vm3, %v1091_v44 }
 0x12c   : > { %v380_v7 = vpop.f32.mrb[0].mxu0  ;;  %v453_v8 = vpop.f32.mrb[0].mxu1 }
 0x12d   : > { %v1285_v10 = vpop.f32.mrb[1].mxu0  ;;  %v1290_v11 = vpop.f32.mrb[1].mxu1  ;;  %1301 = vmatprep.subr.mxu0 %v380_v7  ;;  %1306 = vmatprep.subr.mxu1 %v453_v8 }
 0x12e   : > { %1302 = vmatpush3.msra.mxu0 %v380_v7  ;;  %1307 = vmatpush3.msra.mxu1 %v453_v8 }
 0x12f   : > { %1304 = vmatmul.mubr.msk.f32.vlgmr.msra.gmra.mrb[4].mxu0 %vm310_vm1, %v604_v9  ;;  %1309 = vmatmul.mubr.msk.f32.vlgmr.msra.gmra.mrb[4].mxu1 %vm310_vm1, %v604_v9 }
 0x130   : > { %v526_v12 = vpop.f32.mrb[2].mxu0  ;;  %v599_v13 = vpop.f32.mrb[2].mxu1  ;;  %1313 = vmatprep.mubr.msk.f32.mxu0 %vm310_vm1, %v603_v6  ;;  %1318 = vmatprep.mubr.msk.f32.mxu1 %vm310_vm1, %v603_v6 }
 0x131   : > { %v1295_v14 = vpop.f32.mrb[3].mxu0  ;;  %v1300_v15 = vpop.f32.mrb[3].mxu1  ;;  %1311 = vmatprep.subr.mxu0 %v526_v12  ;;  %1316 = vmatprep.subr.mxu1 %v599_v13 }
 0x132   : > { %1312 = vmatpush3.msra.mxu0 %v526_v12  ;;  %1317 = vmatpush3.msra.mxu1 %v599_v13 }
 0x133   : > { %1314 = vmatmul.mubr.msk.f32.vlgmr.msra.gmra.mrb[6].mxu0 %vm310_vm1, %v604_v9  ;;  %1319 = vmatmul.mubr.msk.f32.vlgmr.msra.gmra.mrb[6].mxu1 %vm310_vm1, %v604_v9 }
 0x202   : > { %v1305_v45 = vpop.f32.mrb[4].mxu0  ;;  %v1310_v46 = vpop.f32.mrb[4].mxu1 }
 0x203   : > { %v677_v47 = vpop.f32.mrb[5].mxu0  ;;  %v752_v48 = vpop.f32.mrb[5].mxu1  ;;  %v919_v49 = vsel %vm911_vm2, %v1305_v45, -inf  ;;  %v920_v50 = vsel %vm911_vm2, %v1310_v46, -inf }
 0x204   : > { %v912_v53 = vsel %vm911_vm2, %v677_v47, -inf  ;;  %v913_v54 = vsel %vm911_vm2, %v752_v48, -inf }
 0x206   : > { %v1315_v51 = vpop.f32.mrb[6].mxu0  ;;  %v1320_v52 = vpop.f32.mrb[6].mxu1 }
 0x207   : > { %v921_v55 = vsel %vm911_vm2, %v1315_v51, -inf  ;;  %v923_v56 = vsel %vm911_vm2, %v1320_v52, -inf  ;;  %v827_v57 = vpop.f32.mrb[7].mxu0  ;;  %v902_v58 = vpop.f32.mrb[7].mxu1 }
 0x208   : > { %v922_v59 = vmax.f32 %v919_v49, %v921_v55  ;;  %v924_v60 = vmax.f32 %v920_v50, %v923_v56  ;;  %v914_v61 = vsel %vm911_vm2, %v827_v57, -inf  ;;  %v916_v62 = vsel %vm911_vm2, %v902_v58, -inf }
 0x209   : > { %v915_v63 = vmax.f32 %v912_v53, %v914_v61  ;;  %v917_v0 = vmax.f32 %v913_v54, %v916_v62 }
 0x20a   : > { %v925_v1 = vmax.f32 %v922_v59, %v924_v60 }
 0x20b   : > { %v918_v2 = vmax.f32 %v915_v63, %v917_v0 }
 0x20c   : > { %v927_v3 = vsub.f32 %v1305_v45, %v925_v1  ;;  %v929_v4 = vsub.f32 %v1310_v46, %v925_v1  ;;  %v931_v5 = vsub.f32 %v1315_v51, %v925_v1  ;;  %v933_v6 = vsub.f32 %v1320_v52, %v925_v1 }
 0x20d   : > { %v926_v7 = vsub.f32 %v677_v47, %v918_v2  ;;  %v928_v8 = vsub.f32 %v752_v48, %v918_v2  ;;  %v930_v9 = vsub.f32 %v827_v57, %v918_v2  ;;  %v932_v10 = vsub.f32 %v902_v58, %v918_v2 }
 0x20e   : > { %v936_v11 = vmul.f32 1.442695, %v927_v3  ;;  %v940_v12 = vmul.f32 1.442695, %v929_v4  ;;  %v944_v13 = vmul.f32 1.442695, %v931_v5  ;;  %v988_v15 = vmul.f32 %v927_v3, %v1800_v16 }
 0x20f   : > { %v948_v14 = vmul.f32 1.442695, %v933_v6  ;;  %v934_v18 = vmul.f32 1.442695, %v926_v7  ;;  %v987_v19 = vmul.f32 %v926_v7, %v1803_v17  ;;  %v938_v21 = vmul.f32 1.442695, %v928_v8 }
 0x210   : > { %1392 = vpow2.f32 %v936_v11  ;;  %v989_v22 = vmul.f32 %v928_v8, %v1810_v20  ;;  %v942_v24 = vmul.f32 1.442695, %v930_v9  ;;  %v946_v25 = vmul.f32 1.442695, %v932_v10 }
 0x211   : > { %1394 = vpow2.f32 %v940_v12  ;;  %v990_v27 = vmul.f32 %v929_v4, %v1815_v23  ;;  %v995_v28 = vsel %vm911_vm2, %v987_v19, 0.0  ;;  %v996_v30 = vsel %vm911_vm2, %v988_v15, 0.0 }
 0x212   : > { %1396 = vpow2.f32 %v944_v13  ;;  %v997_v31 = vadd.f32 %v996_v30, %v995_v28  ;;  %v991_v34 = vmul.f32 %v930_v9, %v1820_v26  ;;  %v998_v35 = vsel %vm911_vm2, %v989_v22, 0.0 }
 0x213   : > { %1398 = vpow2.f32 %v948_v14  ;;  %v992_v37 = vmul.f32 %v931_v5, %v1825_v29  ;;  %v1000_v38 = vsel %vm911_vm2, %v990_v27, 0.0  ;;  %v993_v40 = vmul.f32 %v932_v10, %v1833_v33 }
 0x214   : > { %1400 = vpow2.f32 %v934_v18  ;;  %v999_v36 = vadd.f32 %v998_v35, %v997_v31  ;;  %v1002_v41 = vsel %vm911_vm2, %v991_v34, 0.0  ;;  %v994_v46 = vmul.f32 %v933_v6, %v1830_v32 }
 0x215   : > { %1402 = vpow2.f32 %v938_v21  ;;  %v1004_v47 = vsel %vm911_vm2, %v992_v37, 0.0  ;;  %v1006_v53 = vsel %vm911_vm2, %v993_v40, 0.0 }
 0x216   : > { %1404 = vpow2.f32 %v942_v24  ;;  %v1001_v39 = vadd.f32 %v1000_v38, %v999_v36  ;;  %v1008_v59 = vsel %vm911_vm2, %v994_v46, 0.0 }
 0x217   : > { %1406 = vpow2.f32 %v946_v25 }
 0x218   : > { %v1003_v43 = vadd.f32 %v1002_v41, %v1001_v39 }
 0x21a   : > { %v1393_v42 = vpop.eup %1392  ;;  %v1005_v50 = vadd.f32 %v1004_v47, %v1003_v43 }
 0x21b   : > { %v1395_v44 = vpop.eup %1394  ;;  %v957_v45 = vsel %vm911_vm2, %v1393_v42, 0.0 }
 0x21c   : > { %v1397_v48 = vpop.eup %1396  ;;  %v958_v49 = vsel %vm911_vm2, %v1395_v44, 0.0  ;;  %v1007_v56 = vadd.f32 %v1006_v53, %v1005_v50 }
 0x21d   : > { %v1399_v51 = vpop.eup %1398  ;;  %v959_v52 = vadd.f32 %v958_v49, %v957_v45  ;;  %v960_v55 = vsel %vm911_vm2, %v1397_v48, 0.0 }
 0x21e   : > { %v1401_v54 = vpop.eup %1400  ;;  %v962_v62 = vsel %vm911_vm2, %v1399_v51, 0.0  ;;  %v1009_v0 = vadd.f32 %v1008_v59, %v1007_v56 }
 0x21f   : > { %v1403_v57 = vpop.eup %1402  ;;  %v961_v58 = vadd.f32 %v960_v55, %v959_v52  ;;  %v950_v60 = vsel %vm911_vm2, %v1401_v54, 0.0 }
 0x220   : > { %v1405_v61 = vpop.eup %1404  ;;  %v951_v63 = vsel %vm911_vm2, %v1403_v57, 0.0  ;;  %v1010_v9 = vrot.slane %v1009_v0, 4 }
 0x221   : > { %v1407_v1 = vpop.eup %1406  ;;  %v963_v2 = vadd.f32 %v962_v62, %v961_v58  ;;  %v952_v3 = vadd.f32 %v951_v63, %v950_v60  ;;  %v953_v4 = vsel %vm911_vm2, %v1405_v61, 0.0 }
 0x222   : > { %v955_v6 = vsel %vm911_vm2, %v1407_v1, 0.0  ;;  %v1011_v21 = vadd.f32 %v1010_v9, %v1009_v0 }
 0x223   : > { %1408 = vrcp.f32 %v963_v2  ;;  %v954_v5 = vadd.f32 %v953_v4, %v952_v3 }
 0x224   : > { %1410 = vlog2.f32 %v963_v2  ;;  %v1012_v38 = vrot.slane %v1011_v21, 2 }
 0x225   : > { %v956_v7 = vadd.f32 %v955_v6, %v954_v5 }
 0x226   : > { %v1013_v47 = vadd.f32 %v1012_v38, %v1011_v21 }
 0x227   : > { %1412 = vrcp.f32 %v956_v7 }
 0x228   : > { %1414 = vlog2.f32 %v956_v7  ;;  %v1014_v58 = vrot.slane %v1013_v47, 1 }
 0x22d   : > { %v1409_v8 = vpop.eup %1408 }
 0x22e   : > { %v1411_v10 = vpop.eup %1410  ;;  %v967_v11 = vmul.f32 %v1409_v8, %v1393_v42  ;;  %v973_v12 = vmul.f32 %v1409_v8, %v1399_v51  ;;  %v969_v13 = vmul.f32 %v1409_v8, %v1395_v44  ;;  %v971_v14 = vmul.f32 %v1409_v8, %v1397_v48 }
 0x22f   : > { %v977_v15 = vmul.f32 0.6931472, %v1411_v10  ;;  %v1015_v8 = vadd.f32 %v1014_v58, %v1013_v47 }
 0x230   : > { %v1020_v18 = vmul.f32 %v967_v11, %v1800_v16  ;;  %v1050_v37 = vsel %vm911_vm2, %v967_v11, 0.0  ;;  %v1022_v41 = vmul.f32 %v969_v13, %v1815_v23  ;;  %v1024_v51 = vmul.f32 %v971_v14, %v1825_v29 }
 0x231   : > { %v1413_v19 = vpop.eup %1412  ;;  %v979_v28 = vsel %vm911_vm2, %v977_v15, 0.0  ;;  %v1054_v23 = vsel %vm911_vm2, %v969_v13, 0.0  ;;  %v1058_v63 = vsel %vm911_vm2, %v971_v14, 0.0 }
 0x232   : > { %v1415_v22 = vpop.eup %1414  ;;  %v966_v24 = vmul.f32 %v1413_v19, %v1401_v54  ;;  %v968_v25 = vmul.f32 %v1413_v19, %v1403_v57  ;;  %v970_v27 = vmul.f32 %v1413_v19, %v1405_v61  ;;  %v972_v30 = vmul.f32 %v1413_v19, %v1407_v1 }
 0x233   : > { %v975_v31 = vmul.f32 0.6931472, %v1415_v22  ;;  %v1028_v36 = vsel %vm911_vm2, %v1020_v18, 0.0  ;;  %v1032_v52 = vsel %vm911_vm2, %v1022_v41, 0.0  ;;  %v1026_v61 = vmul.f32 %v973_v12, %v1830_v32 }
 0x234   : > { %v1019_v34 = vmul.f32 %v966_v24, %v1803_v17  ;;  %v1021_v35 = vmul.f32 %v968_v25, %v1810_v20  ;;  %v1049_v39 = vsel %vm911_vm2, %v966_v24, 0.0  ;;  %v1023_v17 = vmul.f32 %v970_v27, %v1820_v26 }
 0x235   : > { %v978_v16 = vsel %vm911_vm2, %v975_v31, 0.0  ;;  %v1051_v44 = vadd.f32 %v1050_v37, %v1049_v39  ;;  %v1052_v46 = vsel %vm911_vm2, %v968_v25, 0.0  ;;  %v1025_v56 = vmul.f32 %v972_v30, %v1833_v33 }
 0x236   : > { %v980_v40 = vadd.f32 %v979_v28, %v978_v16  ;;  %v1027_v42 = vsel %vm911_vm2, %v1019_v34, 0.0  ;;  %v1030_v20 = vsel %vm911_vm2, %v1021_v35, 0.0  ;;  %v1034_v26 = vsel %vm911_vm2, %v1023_v17, 0.0 }
 0x237   : > { %v1029_v43 = vadd.f32 %v1028_v36, %v1027_v42  ;;  %v1053_v49 = vadd.f32 %v1052_v46, %v1051_v44  ;;  %v1056_v57 = vsel %vm911_vm2, %v970_v27, 0.0  ;;  %v1036_v29 = vsel %vm911_vm2, %v1024_v51, 0.0 }
 0x238   : > { %v981_v45 = vrot.slane %v980_v40, 4  ;;  %v1038_v33 = vsel %vm911_vm2, %v1025_v56, 0.0  ;;  %v1060_v3 = vsel %vm911_vm2, %v972_v30, 0.0  ;;  %v1040_v6 = vsel %vm911_vm2, %v1026_v61, 0.0 }
 0x239   : > { %v1031_v48 = vadd.f32 %v1030_v20, %v1029_v43  ;;  %v1055_v54 = vadd.f32 %v1054_v23, %v1053_v49  ;;  %v1062_v32 = vsel %vm911_vm2, %v973_v12, 0.0 }
 0x23a   : > { %v982_v50 = vadd.f32 %v981_v45, %v980_v40 }
 0x23b   : > { %v1033_v53 = vadd.f32 %v1032_v52, %v1031_v48  ;;  %v1057_v60 = vadd.f32 %v1056_v57, %v1055_v54 }
 0x23c   : > { %v983_v55 = vrot.slane %v982_v50, 2 }
 0x23d   : > { %v1035_v59 = vadd.f32 %v1034_v26, %v1033_v53  ;;  %v1059_v1 = vadd.f32 %v1058_v63, %v1057_v60 }
 0x23e   : > { %v984_v62 = vadd.f32 %v983_v55, %v982_v50 }
 0x23f   : > { %v1037_v0 = vadd.f32 %v1036_v29, %v1035_v59  ;;  %v1061_v5 = vadd.f32 %v1060_v3, %v1059_v1 }
 0x240   : > { %v985_v2 = vrot.slane %v984_v62, 1 }
 0x241   : > { %v1039_v4 = vadd.f32 %v1038_v33, %v1037_v0  ;;  %v1063_v10 = vadd.f32 %v1062_v32, %v1061_v5 }
 0x242   : > { %v986_v7 = vadd.f32 %v985_v2, %v984_v62 }
 0x243   : > { %v1041_v9 = vadd.f32 %v1040_v6, %v1039_v4  ;;  %v1064_v14 = vrot.slane %v1063_v10, 4 }
 0x244   : > { %v1016_v11 = vsub.f32 %v986_v7, %v1015_v8 }
 0x245   : > { %v1042_v13 = vrot.slane %v1041_v9, 4  ;;  %v1065_v18 = vadd.f32 %v1064_v14, %v1063_v10 }
 0x246   : > { %1018 = vst.msk [vmem:[%s1840_s14] sm:$0x1] %vm1017_vm3, %v1016_v11 }
 0x247   : > { %v1043_v15 = vadd.f32 %v1042_v13, %v1041_v9  ;;  %v1066_v21 = vrot.slane %v1065_v18, 2 }
 0x249   : > { %v1044_v19 = vrot.slane %v1043_v15, 2  ;;  %v1067_v12 = vadd.f32 %v1066_v21, %v1065_v18 }
 0x24b   : > { %v1045_v22 = vadd.f32 %v1044_v19, %v1043_v15  ;;  %v1068_v25 = vrot.slane %v1067_v12, 1 }
 0x24d   : > { %v1046_v24 = vrot.slane %v1045_v22, 1  ;;  %v1069_v28 = vadd.f32 %v1068_v25, %v1067_v12 }
 0x24f   : > { %v1047_v27 = vadd.f32 %v1046_v24, %v1045_v22  ;;  %1070 = vst.msk [vmem:[%s1840_s14 + $0x2] sm:$0x1] %vm1017_vm3, %v1069_v28 }
 0x251   : > { %1048 = vst.msk [vmem:[%s1840_s14 + $0x1] sm:$0x1] %vm1017_vm3, %v1047_v27 }
 0x252   : > { %1489 = shalt.err (!%p1486_p11)
}
 0x253   : > { %s1490_s25 = scalar_lea.hbm %s1909_s5, 64  ;;  %s1494_s24 = scalar_lea.hbm %s1966_s4, 128 }
 0x254   : > { %p1491_p1 = scmp.ne.s32.totalorder %s1909_s5, %s1490_s25  ;;  %p1495_p5 = scmp.lt.u32.totalorder %s1909_s5, %s1966_s4 }
 0x255   : > { %p1496_p4 = scmp.lt.u32.totalorder %s1494_s24, %s1490_s25  ;;  %p1498_p0 = scmp.lt.u32.totalorder %s1490_s25, %s1909_s5 }
 0x256   : > { %p1492_p6 = pnand %p1491_p1, %p1979_p3 }
 0x257   : > { %p1497_p8 = por %p1496_p4, %p1495_p5 }
 0x258   : > { %p1493_p2 = pneg %p1492_p6 }
 0x259   : > { %p1499_p12 = por %p1498_p0, %p1497_p8 }
 0x25b   : > { %p1500_p13 = pnand %p1499_p12, %p1493_p2 }
 0x25d   : > { %1503 = shalt.err (!%p1500_p13)
}
 0x25e   : > { %1325 = dma.vmem_to_hbm [thread:$0]  (%p1979_p3), %s1911_s6, 64, %s1909_s5, %s1094_s18  }
 0x25f PF: > { %s1120_s14 = sand.u32 1, %s1542_s15   ;;  %p1980_p7 = scmp.ne.s32.totalorder %s1973_s30, 0 }
 0x260   : > { %p1981_p10 = scmp.ge.s32.totalorder %s1562_s20, 2  ;;  %s1121_s12 = scalar_lea.sflag [#allocation4], %s1120_s14 }
 0x262   : > { %p1335_p9 = pnand %p1981_p10, %p1980_p7 }
 0x264   : > { %1537 = dma.done.wait (!%p1335_p9), %s1121_s12, 64  }
 0x265   : > { %1539 = vsyncadd (!%p1335_p9), %s1121_s12, 4294967232  ;;  %s23_s20 = sadd.s32 1, %s1562_s20   ;;  %s1982_s15 = smov %s1546_s16 }
 0x266   : > { %p20_p11 = scmp.ge.s32.totalorder %s23_s20, 4   ;;  %s1983_s16 = smov %s1550_s17 }
 0x267   : > { %s1984_s17 = smov %s1652_s29  ;;  %s1985_s18 = smov %s1558_s19 }
 0x268   : > { %s1986_s19 = smov %s1988_s23  ;;  %22 = sbr.rel (!%p20_p11) target bundleno = 8 (0x8), region = 97 }
 0x26f   :  { %1126 = vsyncpa [#allocation3], 1 }
 0x270   :  { %1128 = vsyncpa [#allocation3 + $0x1], 1 }
 0x271   :  { %1129 = vsyncpa [#allocation6], 1 }
 0x272   :  { %1131 = vsyncpa [#allocation6 + $0x1], 1 }
 0x273   :  { %1132 = vsyncpa [#allocation4], 1 }
 0x274   :  { %1134 = vsyncpa [#allocation4 + $0x1], 1 }

</bundles_post_ra>
